<compile_context>
chip_gen: v6e
topology: v6e:2x2x1
jax: 0.10.0
libtpu: 0.0.40
codegen_flags: <defaults>
</compile_context>

<pallas_src>
import jax
import jax.numpy as jnp
from jax.experimental import pallas as pl
from jax.experimental.pallas import tpu as pltpu


_TARGET_BLOCK_ELEMS = 2 * 1024 * 1024   # ~8 MiB f32 / ~4 MiB bf16 per block
_VMEM_LIMIT_BYTES = 48 * 1024 * 1024    # double-buffered in+out stays <= ~32 MiB


def _cdiv(a: int, b: int) -> int:
    return -(-a // b)


def _sublane_multiple(dtype) -> int:
    itemsize = jnp.dtype(dtype).itemsize
    if itemsize >= 4:
        return 8
    if itemsize == 2:
        return 16
    return 32


def _pick_lane_width(total: int) -> int:
    """Lane-dense width (multiple of 128) dividing `total` (total % 128 == 0)."""
    for c in (4096, 2048, 1024, 512, 384, 256, 128):
        if total % c == 0:
            return c
    return 128


def _is_v7x() -> bool:
    try:
        return "v7" in jax.devices()[0].device_kind.lower()
    except Exception:
        return False


def _sine_kernel(w0_ref, x_ref, o_ref):
    # w0 lives in SMEM as a (1,1) f32 scalar; compute in f32, cast on store.
    w0 = w0_ref[0, 0]
    xv = x_ref[...].astype(jnp.float32)
    # TODO(synk): if VALU-bound on v7x (3.2 TB/s HBM), replace jnp.sin with a
    # cheaper range-reduction + low-degree polynomial (args bounded by w0*|x|).
    o_ref[...] = jnp.sin(w0 * xv).astype(o_ref.dtype)


def _sine_bulk(flat: jax.Array, w0_arr: jax.Array) -> jax.Array:
    """Run the Pallas kernel on a 1-D array whose length is a multiple of 128."""
    total = flat.shape[0]
    dtype = flat.dtype
    s = _sublane_multiple(dtype)

    C = _pick_lane_width(total)
    x2 = flat.reshape(-1, C)
    R = x2.shape[0]

    rows_per_block = max(s, (_TARGET_BLOCK_ELEMS // C) // s * s)
    tr = min(R, rows_per_block)
    if tr < R:
        tr = max(s, (tr // s) * s)
        if _is_v7x():
            # Prefer an even number of grid steps so both TensorCores get
            # equal work; only accept the smaller tile if it really is even.
            grid_n = _cdiv(R, tr)
            if grid_n > 1 and grid_n % 2 == 1:
                tr2 = _cdiv(_cdiv(R, grid_n + 1), s) * s
                if 0 < tr2 <= tr and _cdiv(R, tr2) % 2 == 0:
                    tr = tr2
    grid = (_cdiv(R, tr),)

    out2 = pl.pallas_call(
        _sine_kernel,
        out_shape=jax.ShapeDtypeStruct((R, C), dtype),
        grid=grid,
        in_specs=[
            pl.BlockSpec(memory_space=pltpu.MemorySpace.SMEM),  # w0 scalar
            pl.BlockSpec((tr, C), lambda i: (i, 0)),
        ],
        out_specs=pl.BlockSpec((tr, C), lambda i: (i, 0)),
        compiler_params=pltpu.CompilerParams(
            dimension_semantics=("parallel",),
            vmem_limit_bytes=_VMEM_LIMIT_BYTES,
        ),
    )(w0_arr, x2)
    return out2.reshape(-1)


def sine(x: jax.Array, w0: float = 1.0) -> jax.Array:
    """Pallas TPU implementation of SIREN Sine: sin(w0 * x)."""
    orig_shape = x.shape
    dtype = x.dtype
    total = int(x.size)
    if total == 0:
        return x

    w0_arr = jnp.array([[w0]], dtype=jnp.float32)
    flat = x.reshape(-1)  # free reshape of a contiguous array

    bulk = (total // 128) * 128
    if bulk == 0:
        # <128 elements: not worth a kernel launch.
        y = jnp.sin(w0_arr[0, 0] * flat.astype(jnp.float32)).astype(dtype)
        return y.reshape(orig_shape)

    if bulk == total:
        out_flat = _sine_bulk(flat, w0_arr)
    else:
        # Kernel on the 128-aligned bulk; tiny (<128 elem) tail in plain JAX.
        out_bulk = _sine_bulk(flat[:bulk], w0_arr)
        tail = flat[bulk:]
        out_tail = jnp.sin(w0_arr[0, 0] * tail.astype(jnp.float32)).astype(dtype)
        out_flat = jnp.concatenate([out_bulk, out_tail])

    return out_flat.reshape(orig_shape)


if __name__ == "__main__":
    key = jax.random.PRNGKey(0)
    w0 = 30.0  # typical SIREN w0 (module default is 1.0; any scalar works)

    # Primary test: shape consistent with a SIREN activation map (f32).
    x = jax.random.normal(key, (2, 4, 16, 16), dtype=jnp.float32)
    y = jax.block_until_ready(sine(x, w0=w0))
    ref = jnp.sin(w0 * x)
    assert y.shape == x.shape and y.dtype == x.dtype
    assert jnp.allclose(y, ref, atol=1e-4, rtol=1e-4)

    k1, k2, k3 = jax.random.split(key, 3)

    # Total not divisible by 128 but > 128 -> bulk kernel + jnp tail path.
    x_mix = jax.random.normal(k1, (2, 4, 33), dtype=jnp.float32)  # 264 elems
    y_mix = jax.block_until_ready(sine(x_mix, w0=w0))
    assert y_mix.shape == x_mix.shape
    assert jnp.allclose(y_mix, jnp.sin(w0 * x_mix), atol=1e-4, rtol=1e-4)

    # Tiny odd total (<128) -> pure JAX fallback path.
    x_odd = jax.random.normal(k2, (3, 5, 7), dtype=jnp.float32)   # 105 elems
    y_odd = jax.block_until_ready(sine(x_odd, w0=w0))
    assert y_odd.shape == x_odd.shape
    assert jnp.allclose(y_odd, jnp.sin(w0 * x_odd), atol=1e-4, rtol=1e-4)

    # bf16 input: compare against a reference with the SAME semantics as the
    # kernel (multiply + sin in f32, cast to bf16 on store).  Comparing against
    # a bf16-argument sin is meaningless at w0=30 (argument error ~0.4 rad).
    x_bf = jax.random.normal(k3, (2, 8, 32), dtype=jnp.bfloat16)
    y_bf = jax.block_until_ready(sine(x_bf, w0=w0))
    assert y_bf.dtype == jnp.bfloat16 and y_bf.shape == x_bf.shape
    ref_bf = jnp.sin(w0 * x_bf.astype(jnp.float32)).astype(jnp.bfloat16)
    assert jnp.allclose(
        y_bf.astype(jnp.float32),
        ref_bf.astype(jnp.float32),
        atol=2e-2,
        rtol=2e-2,
    )

    print("KERNEL_OK")
</pallas_src>

<mosaic_0001>
module attributes {stable_mosaic.version = 11 : i64} {
  func.func @_sine_kernel(%arg0: i32, %arg1: memref<1x1xf32, #tpu.memory_space<smem>>, %arg2: memref<1x2048xf32, #tpu.memory_space<vmem>>, %arg3: memref<1x2048xf32, #tpu.memory_space<vmem>>) attributes {dimension_semantics = [#tpu.dimension_semantics<parallel>], iteration_bounds = array<i64: 1>, scalar_prefetch = 0 : i64, scratch_operands = 0 : i64, tpu.core_type = #tpu.core_type<tc>, window_params = [{transform_indices = @transform_0, window_bounds = array<i64: 1, 1>}, {transform_indices = @transform_1, window_bounds = array<i64: 1, 2048>}, {transform_indices = @transform_2, window_bounds = array<i64: 1, 2048>}]} {
    %c0 = arith.constant 0 : index
    %c0_0 = arith.constant 0 : index
    %0 = memref.load %arg1[%c0, %c0_0] : memref<1x1xf32, #tpu.memory_space<smem>>
    %c0_1 = arith.constant 0 : index
    %c0_2 = arith.constant 0 : index
    %1 = vector.load %arg2[%c0_1, %c0_2] : memref<1x2048xf32, #tpu.memory_space<vmem>>, vector<1x2048xf32>
    %2 = vector.broadcast %0 : f32 to vector<1x2048xf32>
    %3 = arith.mulf %2, %1 : vector<1x2048xf32>
    %4 = math.sin %3 : vector<1x2048xf32>
    %c0_3 = arith.constant 0 : index
    %c0_4 = arith.constant 0 : index
    %5 = vector.load %arg3[%c0_3, %c0_4] : memref<1x2048xf32, #tpu.memory_space<vmem>>, vector<1x2048xf32>
    tpu.vector_store %arg3[%c0_3, %c0_4], %4 {strides = array<i32>} : memref<1x2048xf32, #tpu.memory_space<vmem>>, vector<1x2048xf32>,
    return
  }
  func.func @transform_0(%arg0: i32) -> (i32, i32) {
    %c0_i32 = arith.constant 0 : i32
    %c0_i32_0 = arith.constant 0 : i32
    %c0_i32_1 = arith.constant 0 : i32
    return %c0_i32, %c0_i32_0 : i32, i32
  }
  func.func @transform_1(%arg0: i32) -> (i32, i32) {
    %c0_i32 = arith.constant 0 : i32
    %c0_i32_0 = arith.constant 0 : i32
    return %arg0, %c0_i32 : i32, i32
  }
  func.func @transform_2(%arg0: i32) -> (i32, i32) {
    %c0_i32 = arith.constant 0 : i32
    %c0_i32_0 = arith.constant 0 : i32
    return %arg0, %c0_i32 : i32, i32
  }
}

</mosaic_0001>

<bundles_post_ra>
// kernel: tpu_custom_call.1
= control target key start
LH: loop header
LB: loop body
LE: loop exit
PB: predicated region body
PF: predicated region fallthrough
CT: control target
= control target key end

     0   :  { %8 = vsyncpa [#allocation4], 0  ;;  %s442_s0 = inlined_call_operand.<no memory space> [shape: f32[1,1], index: 0, kind: input, shape index: {}]   ;;  %s443_s1 = inlined_call_operand.hbm [shape: f32[1,2048], index: 1, kind: input, shape index: {}]   ;;  %s444_s2 = inlined_call_operand.hbm [shape: f32[1,2048], index: 2, kind: output, shape index: {}]  }
   0x1   :  { %9 = vsyncpa [#allocation5], 0  ;;  %s332_s9 = smov [#allocation3]  }
   0x2   :  { %s18_s10 = sshll.u32 %s332_s9, 4  ;;  %s19_s10 = int_to_ptr.vmem [resolvable:$true] %s18_s10 }
   0x3   :  { %s296_s11 = scalar_lea.vmem %s19_s10, 256  ;;  %p301_p1 = scmp.lt.s32.totalorder %s19_s10, %s19_s10 }
   0x4   :  { %p297_p0 = scmp.ne.s32.totalorder %s19_s10, %s296_s11  ;;  %p302_p2 = scmp.lt.s32.totalorder %s296_s11, %s296_s11 }
   0x6   :  { %p303_p3 = por %p302_p2, %p301_p1 }
   0x8   :  { %p304_p4 = pnand %p303_p3, %p297_p0 }
   0xa   :  { %307 = shalt.err (!%p304_p4)
}
   0xb   :  { %21 = dma.hbm_to_vmem [thread:$0]  %s443_s1, 256, %s19_s10, [#allocation4]  }
   0xc   :  { %328 = dma.done.wait [#allocation4], 256  }
   0xd   :  { %329 = vsyncadd [#allocation4], 4294967040  ;;  %v28_v0 = vstv %s442_s0  ;;  %v26_v1 = vld [vmem:[#allocation3] sm:$0xff]  ;;  %v27_v2 = vld [vmem:[#allocation3 + $0x8] sm:$0xff]  ;;  %v333_v27 = vmov 683565275  }
   0xe   :  { %v361_v3 = vmul.f32 %v28_v0, %v26_v1  ;;  %v363_v4 = vmul.f32 %v28_v0, %v27_v2  ;;  %v334_v29 = vmov 2475754826   ;;  %v335_v31 = vmov 2131351028   ;;  %s339_s0 = smov [#allocation6]  }
   0xf   :  { %v336_v33 = vmov 2102212464   ;;  %v337_v35 = vmov 920167782   ;;  %v338_v43 = vmov 1326507024  }
  0x10   :  { %v31_v5 = vand.u32 2147483647, %v361_v3  ;;  %v34_v6 = vand.u32 2139095040, %v361_v3  ;;  %v135_v7 = vand.u32 2147483647, %v363_v4  ;;  %v138_v8 = vand.u32 2139095040, %v363_v4 }
  0x11   :  { %vm33_vm14 = vcmp.lt.s32.totalorder %v361_v3, 0  ;;  %s247_s1 = sshll.u32 %s339_s0, 4  ;;  %s248_s1 = int_to_ptr.vmem [resolvable:$true] %s247_s1 }
  0x12   :  { %v35_v9 = vshrl.u32 %v34_v6, 23  ;;  %v38_v10 = vand.u32 8388607, %v31_v5  ;;  %v139_v11 = vshrl.u32 %v138_v8, 23  ;;  %v142_v12 = vand.u32 8388607, %v135_v7  ;;  %p313_p6 = scmp.lt.s32.totalorder %s248_s1, %s248_s1 }
  0x13   :  { %vm424_vm15 = vcmp.le.f32.partialorder %v31_v5, 0.7853982  ;;  %s308_s16 = scalar_lea.vmem %s248_s1, 256 }
  0x14   :  { %v256_v13 = vadd.s32 4294967169, %v35_v9  ;;  %v260_v14 = vadd.s32 4294967169, %v139_v11  ;;  %v39_v16 = vor.u32 8388608, %v38_v10  ;;  %v143_v17 = vor.u32 8388608, %v142_v12  ;;  %p309_p5 = scmp.ne.s32.totalorder %s248_s1, %s308_s16  ;;  %p314_p7 = scmp.lt.s32.totalorder %s308_s16, %s308_s16 }
  0x16   :  { %v41_v15 = vadd.s32 1, %v256_v13  ;;  %v145_v18 = vadd.s32 1, %v260_v14  ;;  %v373_v23 = vshll.u32 %v39_v16, 8  ;;  %v375_v25 = vshll.u32 %v143_v17, 8  ;;  %p315_p8 = por %p314_p7, %p313_p6 }
  0x18   :  { %vm42_vm0 = vcmp.gt.s32.totalorder %v41_v15, 0  ;;  %vm146_vm1 = vcmp.gt.s32.totalorder %v145_v18, 0  ;;  %p316_p9 = pnand %p315_p8, %p309_p5 }
  0x19   :  { %v43_v19 = vsel %vm42_vm0, %v41_v15, 0  ;;  %v147_v22 = vsel %vm146_vm1, %v145_v18, 0  ;;  %vm137_vm0 = vcmp.lt.s32.totalorder %v363_v4, 0  ;;  %vm136_vm1 = vcmp.le.f32.partialorder %v135_v7, 0.7853982 }
  0x1a   :  { %v44_v20 = vshrl.u32 %v43_v19, 5  ;;  %v45_v21 = vand.u32 31, %v43_v19  ;;  %v149_v24 = vand.u32 31, %v147_v22  ;;  %v377_v37 = vshrl.u32 %v147_v22, 5 }
  0x1c   :  { %v46_v26 = vsub.s32 32, %v45_v21  ;;  %v48_v28 = vshll.u32 %v333_v27, %v45_v21  ;;  %v51_v30 = vshll.u32 %v334_v29, %v45_v21  ;;  %v54_v32 = vshll.u32 %v335_v31, %v45_v21 }
  0x1d   :  { %v57_v34 = vshll.u32 %v336_v33, %v45_v21  ;;  %v60_v36 = vshll.u32 %v337_v35, %v45_v21  ;;  %vm63_vm2 = vcmp.lt.s32.totalorder %v44_v20, 1  ;;  %vm64_vm3 = vcmp.lt.s32.totalorder %v44_v20, 2 }
  0x1e   :  { %v47_v38 = vshrl.u32 %v333_v27, %v46_v26  ;;  %v49_v39 = vshrl.u32 %v334_v29, %v46_v26  ;;  %v52_v40 = vshrl.u32 %v335_v31, %v46_v26  ;;  %v55_v41 = vshrl.u32 %v336_v33, %v46_v26 }
  0x1f   :  { %v58_v42 = vshrl.u32 %v337_v35, %v46_v26  ;;  %v61_v44 = vshrl.u32 %v338_v43, %v46_v26  ;;  %vm66_vm4 = vcmp.lt.s32.totalorder %v44_v20, 4  ;;  %v150_v48 = vsub.s32 32, %v149_v24 }
  0x20   :  { %v50_v45 = vor.u32 %v49_v39, %v48_v28  ;;  %v53_v46 = vor.u32 %v52_v40, %v51_v30  ;;  %v56_v47 = vor.u32 %v55_v41, %v54_v32  ;;  %vm65_vm5 = vcmp.lt.s32.totalorder %v44_v20, 3 }
  0x21   :  { %v59_v49 = vor.u32 %v58_v42, %v57_v34  ;;  %v62_v50 = vor.u32 %v61_v44, %v60_v36  ;;  %v152_v51 = vshll.u32 %v333_v27, %v149_v24  ;;  %v155_v59 = vshll.u32 %v334_v29, %v149_v24 }
  0x22   :  { %v67_v52 = vsel %vm63_vm2, %v47_v38, %v50_v45  ;;  %v68_v53 = vsel %vm66_vm4, %v56_v47, 2102212464  ;;  %v71_v54 = vsel %vm63_vm2, %v50_v45, %v53_v46  ;;  %v75_v55 = vsel %vm63_vm2, %v53_v46, %v56_v47 }
  0x23   :  { %v69_v56 = vsel %vm65_vm5, %v53_v46, %v68_v53  ;;  %v72_v57 = vsel %vm66_vm4, %v59_v49, 920167782  ;;  %v76_v58 = vsel %vm66_vm4, %v62_v50, 1326507024  ;;  %v151_v62 = vshrl.u32 %v333_v27, %v150_v48 }
  0x24   :  { %v73_v60 = vsel %vm65_vm5, %v56_v47, %v72_v57  ;;  %v77_v61 = vsel %vm65_vm5, %v59_v49, %v76_v58  ;;  %v153_v63 = vshrl.u32 %v334_v29, %v150_v48  ;;  %v70_v0 = vsel %vm64_vm3, %v67_v52, %v69_v56 }
  0x25   :  { %v74_v1 = vsel %vm64_vm3, %v71_v54, %v73_v60  ;;  %v78_v2 = vsel %vm64_vm3, %v75_v55, %v77_v61  ;;  %v156_v6 = vshrl.u32 %v335_v31, %v150_v48  ;;  %v158_v14 = vshll.u32 %v335_v31, %v149_v24 }
  0x26   :  { %v386_v8 = vmul.u32.u64.low %v373_v23, %v78_v2  ;;  %v387_v9 = vmul.u32.u64.high %v373_v23, %v78_v2, %v386_v8  ;;  %v390_v10 = vmul.u32.u64.low %v373_v23, %v74_v1  ;;  %v391_v11 = vmul.u32.u64.high %v373_v23, %v74_v1, %v390_v10 }
  0x27   :  { %v154_v12 = vor.u32 %v153_v63, %v152_v51  ;;  %v157_v13 = vor.u32 %v156_v6, %v155_v59  ;;  %v159_v15 = vshrl.u32 %v336_v33, %v150_v48  ;;  %v161_v16 = vshll.u32 %v336_v33, %v149_v24 }
  0x28   :  { %v162_v17 = vshrl.u32 %v337_v35, %v150_v48  ;;  %v164_v18 = vshll.u32 %v337_v35, %v149_v24  ;;  %v165_v19 = vshrl.u32 %v338_v43, %v150_v48  ;;  %v86_v20 = vmul.u32 %v373_v23, %v70_v0 }
  0x29   :  { %v160_v21 = vor.u32 %v159_v15, %v158_v14  ;;  %vm167_vm6 = vcmp.lt.s32.totalorder %v377_v37, 1  ;;  %vm168_vm7 = vcmp.lt.s32.totalorder %v377_v37, 2  ;;  %vm88_vm8 = vc.u32 %v387_v9, %v390_v10 }
  0x2a   :  { %v89_v22 = vadd.s32 1, %v391_v11  ;;  %v163_v26 = vor.u32 %v162_v17, %v161_v16  ;;  %vm169_vm9 = vcmp.lt.s32.totalorder %v377_v37, 3  ;;  %v166_v27 = vor.u32 %v165_v19, %v164_v18 }
  0x2b   :  { %vm170_vm10 = vcmp.lt.s32.totalorder %v377_v37, 4  ;;  %v171_v28 = vsel %vm167_vm6, %v151_v62, %v154_v12  ;;  %v175_v24 = vsel %vm167_vm6, %v154_v12, %v157_v13  ;;  %v179_v31 = vsel %vm167_vm6, %v157_v13, %v160_v21 }
  0x2c   :  { %v90_v29 = vsel %vm88_vm8, %v89_v22, %v391_v11  ;;  %v172_v23 = vsel %vm170_vm10, %v160_v21, 2102212464  ;;  %v176_v30 = vsel %vm170_vm10, %v163_v26, 920167782  ;;  %v180_v35 = vsel %vm170_vm10, %v166_v27, 1326507024 }
  0x2d   :  { %v91_v32 = vadd.s32 %v90_v29, %v86_v20  ;;  %v173_v33 = vsel %vm169_vm9, %v157_v13, %v172_v23  ;;  %v177_v34 = vsel %vm169_vm9, %v160_v21, %v176_v30  ;;  %v181_v39 = vsel %vm169_vm9, %v163_v26, %v180_v35 }
  0x2e   :  { %v174_v36 = vsel %vm168_vm7, %v171_v28, %v173_v33  ;;  %v178_v38 = vsel %vm168_vm7, %v175_v24, %v177_v34  ;;  %v182_v41 = vsel %vm168_vm7, %v179_v31, %v181_v39  ;;  %v87_v60 = vadd.s32 %v390_v10, %v387_v9 }
  0x2f   :  { %v92_v40 = vadd.s32 536870912, %v91_v32  ;;  %v408_v42 = vmul.u32.u64.low %v375_v25, %v178_v38  ;;  %v409_v43 = vmul.u32.u64.high %v375_v25, %v178_v38, %v408_v42  ;;  %v190_v47 = vmul.u32 %v375_v25, %v174_v36 }
  0x30   :  { %v412_v44 = vmul.u32.u64.low %v375_v25, %v182_v41  ;;  %v413_v45 = vmul.u32.u64.high %v375_v25, %v182_v41, %v412_v44  ;;  %vm123_vm5 = vweird.f32 %v361_v3  ;;  %vm227_vm9 = vweird.f32 %v363_v4 }
  0x31   :  { %v93_v46 = vshrl.u32 %v92_v40, 30  ;;  %v193_v49 = vadd.s32 1, %v409_v43 }
  0x32   :  { %vm192_vm11 = vc.u32 %v413_v45, %v408_v42  ;;  %v191_v16 = vadd.s32 %v408_v42, %v413_v45 }
  0x33   :  { %v94_v48 = vshll.u32 %v93_v46, 30  ;;  %v194_v37 = vsel %vm192_vm11, %v193_v49, %v409_v43  ;;  %v117_v21 = vsub.s32 4, %v93_v46 }
  0x34   :  { %v195_v51 = vadd.s32 %v194_v37, %v190_v47 }
  0x35   :  { %v95_v50 = vsub.s32 %v91_v32, %v94_v48  ;;  %v118_v30 = vsel %vm33_vm14, %v117_v21, %v93_v46 }
  0x36   :  { %v196_v53 = vadd.s32 536870912, %v195_v51  ;;  %v120_v5 = vsel %vm424_vm15, 0, %v118_v30 }
  0x37   :  { %v97_v52 = vsub.s32 0, %v95_v50  ;;  %v124_v38 = vadd.s32 3, %v120_v5 }
  0x38   :  { %v197_v55 = vshrl.u32 %v196_v53, 30 }
  0x39   :  { %v257_v54 = vmin.u32 %v97_v52, %v95_v50  ;;  %v125_v43 = vand.u32 3, %v124_v38 }
  0x3a   :  { %v198_v57 = vshll.u32 %v197_v55, 30  ;;  %v221_v36 = vsub.s32 4, %v197_v55 }
  0x3b   :  { %v99_v56 = vclz %v257_v54  ;;  %vm130_vm2 = vcmp.eq.s32.totalorder %v125_v43, 2  ;;  %vm127_vm3 = vcmp.eq.s32.totalorder %v125_v43, 0  ;;  %vm126_vm4 = vcmp.lt.s32.totalorder %v125_v43, 2 }
  0x3c   :  { %v199_v59 = vsub.s32 %v195_v51, %v198_v57  ;;  %v222_v41 = vsel %vm137_vm0, %v221_v36, %v197_v55 }
  0x3d   :  { %v258_v58 = vadd.s32 4294967294, %v99_v56  ;;  %v224_v44 = vsel %vm136_vm1, 0, %v222_v41 }
  0x3e   :  { %v201_v61 = vsub.s32 0, %v199_v59  ;;  %v228_v48 = vadd.s32 3, %v224_v44 }
  0x3f   :  { %vm259_vm12 = vcmp.lt.s32.totalorder %v258_v58, 0 }
  0x40   :  { %v102_v25 = vsel %vm259_vm12, 0, %v258_v58  ;;  %v261_v1 = vmin.u32 %v201_v61, %v199_v59  ;;  %v229_v51 = vand.u32 3, %v228_v48 }
  0x41   :  { %v103_v62 = vsub.s32 32, %v102_v25  ;;  %v104_v63 = vshll.u32 %v95_v50, %v102_v25  ;;  %v107_v0 = vsub.s32 4294967266, %v102_v25 }
  0x42   :  { %v203_v8 = vclz %v261_v1  ;;  %vm234_vm6 = vcmp.eq.s32.totalorder %v229_v51, 2  ;;  %vm231_vm7 = vcmp.eq.s32.totalorder %v229_v51, 0  ;;  %vm230_vm8 = vcmp.lt.s32.totalorder %v229_v51, 2 }
  0x43   :  { %v105_v2 = vshrl.u32 %v87_v60, %v103_v62  ;;  %v108_v6 = vadd.s32 127, %v107_v0 }
  0x44   :  { %v262_v13 = vadd.s32 4294967294, %v203_v8 }
  0x45   :  { %v106_v11 = vor.u32 %v105_v2, %v104_v63  ;;  %v109_v12 = vshll.u32 %v108_v6, 23 }
  0x46   :  { %vm263_vm13 = vcmp.lt.s32.totalorder %v262_v13, 0 }
  0x47   :  { %v110_v14 = vor.u32 4788187, %v109_v12  ;;  %v113_v15 = vcvt.s32.f32 %v106_v11  ;;  %v206_v9 = vsel %vm263_vm13, 0, %v262_v13 }
  0x48   :  { %v207_v10 = vsub.s32 32, %v206_v9  ;;  %v208_v18 = vshll.u32 %v199_v59, %v206_v9  ;;  %v211_v19 = vsub.s32 4294967266, %v206_v9 }
  0x49   :  { %v111_v17 = vand.u32 2147483647, %v110_v14 }
  0x4a   :  { %v209_v22 = vshrl.u32 %v191_v16, %v207_v10  ;;  %v212_v26 = vadd.s32 127, %v211_v19 }
  0x4b   :  { %v114_v20 = vmul.f32 %v113_v15, %v111_v17 }
  0x4c   :  { %v210_v24 = vor.u32 %v209_v22, %v208_v18  ;;  %v213_v29 = vshll.u32 %v212_v26, 23 }
  0x4d   :  { %v115_v28 = vxor.u32 2147483648, %v114_v20 }
  0x4e   :  { %v214_v32 = vor.u32 4788187, %v213_v29  ;;  %v217_v33 = vcvt.s32.f32 %v210_v24 }
  0x4f   :  { %v116_v23 = vsel %vm33_vm14, %v115_v28, %v114_v20 }
  0x50   :  { %v119_v31 = vsel %vm424_vm15, %v361_v3, %v116_v23  ;;  %v215_v34 = vand.u32 2147483647, %v214_v32 }
  0x51   :  { %280 = vcosq.f32 %v119_v31 }
  0x52   :  { %282 = vsinq.f32 %v119_v31  ;;  %v218_v35 = vmul.f32 %v217_v33, %v215_v34 }
  0x54   :  { %v219_v39 = vxor.u32 2147483648, %v218_v35 }
  0x56   :  { %v220_v40 = vsel %vm137_vm0, %v219_v39, %v218_v35 }
  0x57   :  { %v223_v42 = vsel %vm136_vm1, %v363_v4, %v220_v40 }
  0x58   :  { %284 = vcosq.f32 %v223_v42 }
  0x59   :  { %286 = vsinq.f32 %v223_v42 }
  0x5e   :  { %v281_v45 = vpop.eup %280 }
  0x5f   :  { %v283_v46 = vpop.eup %282  ;;  %v131_v47 = vxor.u32 2147483648, %v281_v45 }
  0x60   :  { %v128_v49 = vxor.u32 2147483648, %v283_v46 }
  0x61   :  { %v132_v7 = vsel %vm130_vm2, %v131_v47, %v283_v46 }
  0x62   :  { %v129_v50 = vsel %vm127_vm3, %v281_v45, %v128_v49 }
  0x63   :  { %v133_v37 = vsel %vm126_vm4, %v129_v50, %v132_v7 }
  0x64   :  { %v134_v52 = vsel %vm123_vm5, nan, %v133_v37 }
  0x65   :  { %239 = vst [vmem:[#allocation6] sm:$0xff] %v134_v52  ;;  %v285_v53 = vpop.eup %284 }
  0x66   :  { %v287_v54 = vpop.eup %286  ;;  %v235_v55 = vxor.u32 2147483648, %v285_v53 }
  0x67   :  { %v232_v56 = vxor.u32 2147483648, %v287_v54 }
  0x68   :  { %v236_v57 = vsel %vm234_vm6, %v235_v55, %v287_v54 }
  0x69   :  { %v233_v58 = vsel %vm231_vm7, %v285_v53, %v232_v56 }
  0x6a   :  { %v237_v3 = vsel %vm230_vm8, %v233_v58, %v236_v57 }
  0x6b   :  { %v238_v59 = vsel %vm227_vm9, nan, %v237_v3 }
  0x6c   :  { %240 = vst [vmem:[#allocation6 + $0x8] sm:$0xff] %v238_v59 }
  0x6d   :  { %319 = shalt.err (!%p316_p9)
}
  0x6e   :  { %250 = dma.vmem_to_hbm [thread:$0]  %s248_s1, 256, %s444_s2, [#allocation5]  }
  0x6f   :  { %330 = dma.done.wait [#allocation5], 256  }
  0x70   :  { %331 = vsyncadd [#allocation5], 4294967040 }
  0x71   :  { %254 = vsyncpa [#allocation4], 1 }
  0x72   :  { %255 = vsyncpa [#allocation5], 1 }

</bundles_post_ra>
